<compile_context>
chip_gen: v7x
topology: tpu7x:2x2x1
jax: 0.10.0
libtpu: 0.0.40
codegen_flags: <defaults>
</compile_context>

<pallas_src>
import jax
import jax.numpy as jnp
import numpy as np
from jax import lax
from jax.experimental import pallas as pl
from jax.experimental.pallas import tpu as pltpu


# ------------------------------ fused kernel --------------------------------

def _make_fused_kernel(num_layers, seq, batch, hidden, out_dim):
    """Whole Fakespeare forward in one kernel.

    Ref order (inputs, outputs, scratch):
      proj0   : (seq*batch, hidden)   layer-0 x@W_ih^T + (b_ih+b_hh), time-major
      w_hh0^T : (hidden, hidden)
      for l in 1..L-1: w_ih_l^T (hidden, hidden), w_hh_l^T (hidden, hidden),
                       b_l (1, hidden)   [b_ih+b_hh pre-summed]
      fc_w^T  : (hidden, out_dim)
      fc_b    : (1, out_dim)
      out     : (seq*batch, out_dim)        [output, time-major rows]
      h_fin   : (num_layers, batch, hidden) [output]
      y       : (seq*batch, hidden)         [VMEM scratch, last-layer acts]
    """
    n_rest = 3 * (num_layers - 1)

    def kernel(*refs):
        proj0_ref = refs[0]
        whh0t_ref = refs[1]
        layer_refs = refs[2:2 + n_rest]
        fcwt_ref = refs[2 + n_rest]
        fcb_ref = refs[3 + n_rest]
        out_ref = refs[4 + n_rest]
        hfin_ref = refs[5 + n_rest]
        y_ref = refs[6 + n_rest]

        # Loop-invariant weight loads / bias broadcasts, hoisted once.
        w_hh_t = [whh0t_ref[...]]
        w_ih_t = [None]
        biases = [None]
        for l in range(1, num_layers):
            base = 3 * (l - 1)
            w_ih_t.append(layer_refs[base][...])
            w_hh_t.append(layer_refs[base + 1][...])
            biases.append(jnp.broadcast_to(layer_refs[base + 2][...],
                                           (batch, hidden)))

        hs = [jnp.zeros((batch, hidden), jnp.float32)
              for _ in range(num_layers)]

        # Wavefront over time: every layer advances one step per iteration.
        # Fully unrolled (static slices into the 2D slabs).  At larger seq,
        # switch to lax.fori_loop with a bounded unroll and
        # ref[pl.ds(pl.multiple_of(t*batch, batch), batch), :] indexing.
        for t in range(seq):
            row = t * batch
            # Layer 0 pre-activation was hoisted to the wrapper (incl. bias).
            x_in = proj0_ref[row:row + batch, :]                    # (B, H)
            for l in range(num_layers):
                if l == 0:
                    pre = x_in
                else:
                    # h-independent dot: schedules off the recurrence chain.
                    pre = jnp.dot(x_in, w_ih_t[l],
                                  preferred_element_type=jnp.float32)
                    pre = pre + biases[l]
                h_new = jnp.tanh(
                    pre + jnp.dot(hs[l], w_hh_t[l],
                                  preferred_element_type=jnp.float32))
                hs[l] = h_new
                x_in = h_new
            # Only the last layer's activations are needed later (FC head).
            y_ref[row:row + batch, :] = x_in

        for l in range(num_layers):
            hfin_ref[l] = hs[l]

        # FC head off the recurrence: one (seq*batch, H) @ (H, O) matmul and a
        # single dense slab store.
        fc_b = jnp.broadcast_to(fcb_ref[...], (seq * batch, out_dim))
        out_ref[...] = jnp.dot(y_ref[...], fcwt_ref[...],
                               preferred_element_type=jnp.float32) + fc_b

    return kernel


# ------------------------------ wrapper --------------------------------------

@jax.jit
def fakespeare_forward(params, x):
    """x: (batch, seq, input_size) float32 (batch_first, like PyTorch).

    Returns (output, hidden_state):
      output:       (batch*seq, output_size)  rows ordered exactly like
                    output.contiguous().view(-1, hidden_size) in PyTorch
      hidden_state: (num_layers, batch, hidden_size)
    """
    rnn = params["rnn"]
    num_layers = len(rnn)
    batch, seq, _ = x.shape
    hidden = rnn[0][0].shape[0]
    out_dim = params["fc_w"].shape[0]

    # Hoisted layer-0 input projection (+ pre-summed bias), emitted time-major
    # and flattened to a sublane-dense 2D slab (row index = t*batch + b).
    w_ih0, w_hh0, b_ih0, b_hh0 = rnn[0]
    proj0 = jnp.einsum("bsi,hi->sbh", x, w_ih0) + (b_ih0 + b_hh0)
    proj0 = proj0.reshape(seq * batch, hidden).astype(jnp.float32)

    # Pre-transpose every weight once at trace time (free in XLA) so each
    # in-kernel matmul is a plain a @ b.
    inputs = [proj0, w_hh0.T]
    for (w_ih, w_hh, b_ih, b_hh) in rnn[1:]:
        inputs += [w_ih.T, w_hh.T, (b_ih + b_hh).reshape(1, hidden)]
    inputs += [params["fc_w"].T, params["fc_b"].reshape(1, out_dim)]

    vmem = pl.BlockSpec(memory_space=pltpu.MemorySpace.VMEM)
    out_tm, hidden_state = pl.pallas_call(
        _make_fused_kernel(num_layers, seq, batch, hidden, out_dim),
        out_shape=(
            jax.ShapeDtypeStruct((seq * batch, out_dim), jnp.float32),
            jax.ShapeDtypeStruct((num_layers, batch, hidden), jnp.float32),
        ),
        in_specs=[vmem] * len(inputs),
        out_specs=(vmem, vmem),
        scratch_shapes=[pltpu.VMEM((seq * batch, hidden), jnp.float32)],
    )(*inputs)

    # Time-major rows (t*batch + b) -> PyTorch batch_first view(-1, H) order
    # (b*seq + t).  Fuses with the custom call inside the jit.
    out = out_tm.reshape(seq, batch, out_dim)
    out = jnp.transpose(out, (1, 0, 2)).reshape(batch * seq, out_dim)
    return out, hidden_state


# ------------------------- deterministic parameters --------------------------

def init_params(key, input_size, output_size, hidden_size, num_layers):
    """PyTorch-style init: U(-1/sqrt(hidden), 1/sqrt(hidden)) for RNN,
    U(-1/sqrt(in_features), 1/sqrt(in_features)) for Linear."""
    k_rnn = 1.0 / np.sqrt(hidden_size)
    k_fc = 1.0 / np.sqrt(hidden_size)
    rnn_params = []
    for layer in range(num_layers):
        in_dim = input_size if layer == 0 else hidden_size
        key, k1, k2, k3, k4 = jax.random.split(key, 5)
        w_ih = jax.random.uniform(k1, (hidden_size, in_dim), jnp.float32, -k_rnn, k_rnn)
        w_hh = jax.random.uniform(k2, (hidden_size, hidden_size), jnp.float32, -k_rnn, k_rnn)
        b_ih = jax.random.uniform(k3, (hidden_size,), jnp.float32, -k_rnn, k_rnn)
        b_hh = jax.random.uniform(k4, (hidden_size,), jnp.float32, -k_rnn, k_rnn)
        rnn_params.append((w_ih, w_hh, b_ih, b_hh))
    key, k5, k6 = jax.random.split(key, 3)
    fc_w = jax.random.uniform(k5, (output_size, hidden_size), jnp.float32, -k_fc, k_fc)
    fc_b = jax.random.uniform(k6, (output_size,), jnp.float32, -k_fc, k_fc)
    return {"rnn": rnn_params, "fc_w": fc_w, "fc_b": fc_b}


# ------------------------------ pure-JAX reference ---------------------------

def fakespeare_forward_ref(params, x):
    batch, seq, _ = x.shape
    hidden = params["rnn"][0][0].shape[0]
    layer_in = x
    h_finals = []
    for (w_ih, w_hh, b_ih, b_hh) in params["rnn"]:
        h = jnp.zeros((batch, hidden), jnp.float32)
        ys = []
        for t in range(seq):
            h = jnp.tanh(layer_in[:, t] @ w_ih.T + b_ih + h @ w_hh.T + b_hh)
            ys.append(h)
        layer_in = jnp.stack(ys, axis=1)
        h_finals.append(h)
    out = layer_in.reshape(-1, hidden) @ params["fc_w"].T + params["fc_b"]
    return out, jnp.stack(h_finals, axis=0)


# ----------------------------------- main ------------------------------------

if __name__ == "__main__":
    # Small shapes consistent with the module's forward.
    batch_size = 2
    seq_len = 8
    input_size = 16
    hidden_size = 32
    output_size = 16
    num_layers = 2

    key = jax.random.PRNGKey(0)
    key, pkey, xkey = jax.random.split(key, 3)
    params = init_params(pkey, input_size, output_size, hidden_size, num_layers)
    x = jax.random.normal(xkey, (batch_size, seq_len, input_size), jnp.float32)

    out, hidden_state = fakespeare_forward(params, x)
    out = jax.block_until_ready(out)
    hidden_state = jax.block_until_ready(hidden_state)

    # Sanity check against pure-JAX reference.
    out_ref, hidden_ref = fakespeare_forward_ref(params, x)
    np.testing.assert_allclose(np.asarray(out), np.asarray(out_ref),
                               rtol=1e-5, atol=1e-5)
    np.testing.assert_allclose(np.asarray(hidden_state), np.asarray(hidden_ref),
                               rtol=1e-5, atol=1e-5)

    assert out.shape == (batch_size * seq_len, output_size)
    assert hidden_state.shape == (num_layers, batch_size, hidden_size)

    print("KERNEL_OK")
</pallas_src>

<mosaic_0001>
module attributes {stable_mosaic.version = 11 : i64} {
  func.func @kernel(%arg0: memref<16x32xf32, #tpu.memory_space<vmem>>, %arg1: memref<32x32xf32, #tpu.memory_space<vmem>>, %arg2: memref<32x32xf32, #tpu.memory_space<vmem>>, %arg3: memref<32x32xf32, #tpu.memory_space<vmem>>, %arg4: memref<1x32xf32, #tpu.memory_space<vmem>>, %arg5: memref<32x16xf32, #tpu.memory_space<vmem>>, %arg6: memref<1x16xf32, #tpu.memory_space<vmem>>, %arg7: memref<16x16xf32, #tpu.memory_space<vmem>>, %arg8: memref<2x2x32xf32, #tpu.memory_space<vmem>>, %arg9: memref<16x32xf32, #tpu.memory_space<vmem>>) attributes {dimension_semantics = [], scalar_prefetch = 0 : i64, scratch_operands = 1 : i64, tpu.core_type = #tpu.core_type<tc>} {
    %c0 = arith.constant 0 : index
    %c0_0 = arith.constant 0 : index
    %0 = vector.load %arg1[%c0, %c0_0] : memref<32x32xf32, #tpu.memory_space<vmem>>, vector<32x32xf32>
    %c0_1 = arith.constant 0 : index
    %c0_2 = arith.constant 0 : index
    %1 = vector.load %arg2[%c0_1, %c0_2] : memref<32x32xf32, #tpu.memory_space<vmem>>, vector<32x32xf32>
    %c0_3 = arith.constant 0 : index
    %c0_4 = arith.constant 0 : index
    %2 = vector.load %arg3[%c0_3, %c0_4] : memref<32x32xf32, #tpu.memory_space<vmem>>, vector<32x32xf32>
    %c0_5 = arith.constant 0 : index
    %c0_6 = arith.constant 0 : index
    %3 = vector.load %arg4[%c0_5, %c0_6] : memref<1x32xf32, #tpu.memory_space<vmem>>, vector<1x32xf32>
    %4 = vector.shape_cast %3 : vector<1x32xf32> to vector<1x32xf32>
    %5 = vector.broadcast %4 : vector<1x32xf32> to vector<2x32xf32>
    %cst = arith.constant 0.000000e+00 : f32
    %6 = vector.broadcast %cst : f32 to vector<2x32xf32>
    %cst_7 = arith.constant 0.000000e+00 : f32
    %7 = vector.broadcast %cst_7 : f32 to vector<2x32xf32>
    %c0_8 = arith.constant 0 : index
    %c0_9 = arith.constant 0 : index
    %8 = vector.load %arg0[%c0_8, %c0_9] : memref<16x32xf32, #tpu.memory_space<vmem>>, vector<2x32xf32>
    %cst_10 = arith.constant dense<0.000000e+00> : vector<2x32xf32>
    %9 = tpu.matmul %6, %0, %cst_10 {dimension_numbers = #tpu.dot_dimension_numbers<[1], [0], [0], [1], [0, 0, 1, 1], [], []>} : vector<2x32xf32>, vector<32x32xf32>, vector<2x32xf32> -> vector<2x32xf32>
    %10 = arith.addf %8, %9 : vector<2x32xf32>
    %11 = math.tanh %10 : vector<2x32xf32>
    %cst_11 = arith.constant dense<0.000000e+00> : vector<2x32xf32>
    %12 = tpu.matmul %11, %1, %cst_11 {dimension_numbers = #tpu.dot_dimension_numbers<[1], [0], [0], [1], [0, 0, 1, 1], [], []>} : vector<2x32xf32>, vector<32x32xf32>, vector<2x32xf32> -> vector<2x32xf32>
    %13 = arith.addf %12, %5 : vector<2x32xf32>
    %cst_12 = arith.constant dense<0.000000e+00> : vector<2x32xf32>
    %14 = tpu.matmul %7, %2, %cst_12 {dimension_numbers = #tpu.dot_dimension_numbers<[1], [0], [0], [1], [0, 0, 1, 1], [], []>} : vector<2x32xf32>, vector<32x32xf32>, vector<2x32xf32> -> vector<2x32xf32>
    %15 = arith.addf %13, %14 : vector<2x32xf32>
    %16 = math.tanh %15 : vector<2x32xf32>
    %c0_13 = arith.constant 0 : index
    %c0_14 = arith.constant 0 : index
    %17 = vector.load %arg9[%c0_13, %c0_14] : memref<16x32xf32, #tpu.memory_space<vmem>>, vector<2x32xf32>
    tpu.vector_store %arg9[%c0_13, %c0_14], %16 {strides = array<i32>} : memref<16x32xf32, #tpu.memory_space<vmem>>, vector<2x32xf32>,
    %c2 = arith.constant 2 : index
    %c0_15 = arith.constant 0 : index
    %18 = vector.load %arg0[%c2, %c0_15] : memref<16x32xf32, #tpu.memory_space<vmem>>, vector<2x32xf32>
    %cst_16 = arith.constant dense<0.000000e+00> : vector<2x32xf32>
    %19 = tpu.matmul %11, %0, %cst_16 {dimension_numbers = #tpu.dot_dimension_numbers<[1], [0], [0], [1], [0, 0, 1, 1], [], []>} : vector<2x32xf32>, vector<32x32xf32>, vector<2x32xf32> -> vector<2x32xf32>
    %20 = arith.addf %18, %19 : vector<2x32xf32>
    %21 = math.tanh %20 : vector<2x32xf32>
    %cst_17 = arith.constant dense<0.000000e+00> : vector<2x32xf32>
    %22 = tpu.matmul %21, %1, %cst_17 {dimension_numbers = #tpu.dot_dimension_numbers<[1], [0], [0], [1], [0, 0, 1, 1], [], []>} : vector<2x32xf32>, vector<32x32xf32>, vector<2x32xf32> -> vector<2x32xf32>
    %23 = arith.addf %22, %5 : vector<2x32xf32>
    %cst_18 = arith.constant dense<0.000000e+00> : vector<2x32xf32>
    %24 = tpu.matmul %16, %2, %cst_18 {dimension_numbers = #tpu.dot_dimension_numbers<[1], [0], [0], [1], [0, 0, 1, 1], [], []>} : vector<2x32xf32>, vector<32x32xf32>, vector<2x32xf32> -> vector<2x32xf32>
    %25 = arith.addf %23, %24 : vector<2x32xf32>
    %26 = math.tanh %25 : vector<2x32xf32>
    %c2_19 = arith.constant 2 : index
    %c0_20 = arith.constant 0 : index
    %27 = vector.load %arg9[%c2_19, %c0_20] : memref<16x32xf32, #tpu.memory_space<vmem>>, vector<2x32xf32>
    tpu.vector_store %arg9[%c2_19, %c0_20], %26 {strides = array<i32>} : memref<16x32xf32, #tpu.memory_space<vmem>>, vector<2x32xf32>,
    %c4 = arith.constant 4 : index
    %c0_21 = arith.constant 0 : index
    %28 = vector.load %arg0[%c4, %c0_21] : memref<16x32xf32, #tpu.memory_space<vmem>>, vector<2x32xf32>
    %cst_22 = arith.constant dense<0.000000e+00> : vector<2x32xf32>
    %29 = tpu.matmul %21, %0, %cst_22 {dimension_numbers = #tpu.dot_dimension_numbers<[1], [0], [0], [1], [0, 0, 1, 1], [], []>} : vector<2x32xf32>, vector<32x32xf32>, vector<2x32xf32> -> vector<2x32xf32>
    %30 = arith.addf %28, %29 : vector<2x32xf32>
    %31 = math.tanh %30 : vector<2x32xf32>
    %cst_23 = arith.constant dense<0.000000e+00> : vector<2x32xf32>
    %32 = tpu.matmul %31, %1, %cst_23 {dimension_numbers = #tpu.dot_dimension_numbers<[1], [0], [0], [1], [0, 0, 1, 1], [], []>} : vector<2x32xf32>, vector<32x32xf32>, vector<2x32xf32> -> vector<2x32xf32>
    %33 = arith.addf %32, %5 : vector<2x32xf32>
    %cst_24 = arith.constant dense<0.000000e+00> : vector<2x32xf32>
    %34 = tpu.matmul %26, %2, %cst_24 {dimension_numbers = #tpu.dot_dimension_numbers<[1], [0], [0], [1], [0, 0, 1, 1], [], []>} : vector<2x32xf32>, vector<32x32xf32>, vector<2x32xf32> -> vector<2x32xf32>
    %35 = arith.addf %33, %34 : vector<2x32xf32>
    %36 = math.tanh %35 : vector<2x32xf32>
    %c4_25 = arith.constant 4 : index
    %c0_26 = arith.constant 0 : index
    %37 = vector.load %arg9[%c4_25, %c0_26] : memref<16x32xf32, #tpu.memory_space<vmem>>, vector<2x32xf32>
    tpu.vector_store %arg9[%c4_25, %c0_26], %36 {strides = array<i32>} : memref<16x32xf32, #tpu.memory_space<vmem>>, vector<2x32xf32>,
    %c6 = arith.constant 6 : index
    %c0_27 = arith.constant 0 : index
    %38 = vector.load %arg0[%c6, %c0_27] : memref<16x32xf32, #tpu.memory_space<vmem>>, vector<2x32xf32>
    %cst_28 = arith.constant dense<0.000000e+00> : vector<2x32xf32>
    %39 = tpu.matmul %31, %0, %cst_28 {dimension_numbers = #tpu.dot_dimension_numbers<[1], [0], [0], [1], [0, 0, 1, 1], [], []>} : vector<2x32xf32>, vector<32x32xf32>, vector<2x32xf32> -> vector<2x32xf32>
    %40 = arith.addf %38, %39 : vector<2x32xf32>
    %41 = math.tanh %40 : vector<2x32xf32>
    %cst_29 = arith.constant dense<0.000000e+00> : vector<2x32xf32>
    %42 = tpu.matmul %41, %1, %cst_29 {dimension_numbers = #tpu.dot_dimension_numbers<[1], [0], [0], [1], [0, 0, 1, 1], [], []>} : vector<2x32xf32>, vector<32x32xf32>, vector<2x32xf32> -> vector<2x32xf32>
    %43 = arith.addf %42, %5 : vector<2x32xf32>
    %cst_30 = arith.constant dense<0.000000e+00> : vector<2x32xf32>
    %44 = tpu.matmul %36, %2, %cst_30 {dimension_numbers = #tpu.dot_dimension_numbers<[1], [0], [0], [1], [0, 0, 1, 1], [], []>} : vector<2x32xf32>, vector<32x32xf32>, vector<2x32xf32> -> vector<2x32xf32>
    %45 = arith.addf %43, %44 : vector<2x32xf32>
    %46 = math.tanh %45 : vector<2x32xf32>
    %c6_31 = arith.constant 6 : index
    %c0_32 = arith.constant 0 : index
    %47 = vector.load %arg9[%c6_31, %c0_32] : memref<16x32xf32, #tpu.memory_space<vmem>>, vector<2x32xf32>
    tpu.vector_store %arg9[%c6_31, %c0_32], %46 {strides = array<i32>} : memref<16x32xf32, #tpu.memory_space<vmem>>, vector<2x32xf32>,
    %c8 = arith.constant 8 : index
    %c0_33 = arith.constant 0 : index
    %48 = vector.load %arg0[%c8, %c0_33] : memref<16x32xf32, #tpu.memory_space<vmem>>, vector<2x32xf32>
    %cst_34 = arith.constant dense<0.000000e+00> : vector<2x32xf32>
    %49 = tpu.matmul %41, %0, %cst_34 {dimension_numbers = #tpu.dot_dimension_numbers<[1], [0], [0], [1], [0, 0, 1, 1], [], []>} : vector<2x32xf32>, vector<32x32xf32>, vector<2x32xf32> -> vector<2x32xf32>
    %50 = arith.addf %48, %49 : vector<2x32xf32>
    %51 = math.tanh %50 : vector<2x32xf32>
    %cst_35 = arith.constant dense<0.000000e+00> : vector<2x32xf32>
    %52 = tpu.matmul %51, %1, %cst_35 {dimension_numbers = #tpu.dot_dimension_numbers<[1], [0], [0], [1], [0, 0, 1, 1], [], []>} : vector<2x32xf32>, vector<32x32xf32>, vector<2x32xf32> -> vector<2x32xf32>
    %53 = arith.addf %52, %5 : vector<2x32xf32>
    %cst_36 = arith.constant dense<0.000000e+00> : vector<2x32xf32>
    %54 = tpu.matmul %46, %2, %cst_36 {dimension_numbers = #tpu.dot_dimension_numbers<[1], [0], [0], [1], [0, 0, 1, 1], [], []>} : vector<2x32xf32>, vector<32x32xf32>, vector<2x32xf32> -> vector<2x32xf32>
    %55 = arith.addf %53, %54 : vector<2x32xf32>
    %56 = math.tanh %55 : vector<2x32xf32>
    %c8_37 = arith.constant 8 : index
    %c0_38 = arith.constant 0 : index
    %57 = vector.load %arg9[%c8_37, %c0_38] : memref<16x32xf32, #tpu.memory_space<vmem>>, vector<2x32xf32>
    tpu.vector_store %arg9[%c8_37, %c0_38], %56 {strides = array<i32>} : memref<16x32xf32, #tpu.memory_space<vmem>>, vector<2x32xf32>,
    %c10 = arith.constant 10 : index
    %c0_39 = arith.constant 0 : index
    %58 = vector.load %arg0[%c10, %c0_39] : memref<16x32xf32, #tpu.memory_space<vmem>>, vector<2x32xf32>
    %cst_40 = arith.constant dense<0.000000e+00> : vector<2x32xf32>
    %59 = tpu.matmul %51, %0, %cst_40 {dimension_numbers = #tpu.dot_dimension_numbers<[1], [0], [0], [1], [0, 0, 1, 1], [], []>} : vector<2x32xf32>, vector<32x32xf32>, vector<2x32xf32> -> vector<2x32xf32>
    %60 = arith.addf %58, %59 : vector<2x32xf32>
    %61 = math.tanh %60 : vector<2x32xf32>
    %cst_41 = arith.constant dense<0.000000e+00> : vector<2x32xf32>
    %62 = tpu.matmul %61, %1, %cst_41 {dimension_numbers = #tpu.dot_dimension_numbers<[1], [0], [0], [1], [0, 0, 1, 1], [], []>} : vector<2x32xf32>, vector<32x32xf32>, vector<2x32xf32> -> vector<2x32xf32>
    %63 = arith.addf %62, %5 : vector<2x32xf32>
    %cst_42 = arith.constant dense<0.000000e+00> : vector<2x32xf32>
    %64 = tpu.matmul %56, %2, %cst_42 {dimension_numbers = #tpu.dot_dimension_numbers<[1], [0], [0], [1], [0, 0, 1, 1], [], []>} : vector<2x32xf32>, vector<32x32xf32>, vector<2x32xf32> -> vector<2x32xf32>
    %65 = arith.addf %63, %64 : vector<2x32xf32>
    %66 = math.tanh %65 : vector<2x32xf32>
    %c10_43 = arith.constant 10 : index
    %c0_44 = arith.constant 0 : index
    %67 = vector.load %arg9[%c10_43, %c0_44] : memref<16x32xf32, #tpu.memory_space<vmem>>, vector<2x32xf32>
    tpu.vector_store %arg9[%c10_43, %c0_44], %66 {strides = array<i32>} : memref<16x32xf32, #tpu.memory_space<vmem>>, vector<2x32xf32>,
    %c12 = arith.constant 12 : index
    %c0_45 = arith.constant 0 : index
    %68 = vector.load %arg0[%c12, %c0_45] : memref<16x32xf32, #tpu.memory_space<vmem>>, vector<2x32xf32>
    %cst_46 = arith.constant dense<0.000000e+00> : vector<2x32xf32>
    %69 = tpu.matmul %61, %0, %cst_46 {dimension_numbers = #tpu.dot_dimension_numbers<[1], [0], [0], [1], [0, 0, 1, 1], [], []>} : vector<2x32xf32>, vector<32x32xf32>, vector<2x32xf32> -> vector<2x32xf32>
    %70 = arith.addf %68, %69 : vector<2x32xf32>
    %71 = math.tanh %70 : vector<2x32xf32>
    %cst_47 = arith.constant dense<0.000000e+00> : vector<2x32xf32>
    %72 = tpu.matmul %71, %1, %cst_47 {dimension_numbers = #tpu.dot_dimension_numbers<[1], [0], [0], [1], [0, 0, 1, 1], [], []>} : vector<2x32xf32>, vector<32x32xf32>, vector<2x32xf32> -> vector<2x32xf32>
    %73 = arith.addf %72, %5 : vector<2x32xf32>
    %cst_48 = arith.constant dense<0.000000e+00> : vector<2x32xf32>
    %74 = tpu.matmul %66, %2, %cst_48 {dimension_numbers = #tpu.dot_dimension_numbers<[1], [0], [0], [1], [0, 0, 1, 1], [], []>} : vector<2x32xf32>, vector<32x32xf32>, vector<2x32xf32> -> vector<2x32xf32>
    %75 = arith.addf %73, %74 : vector<2x32xf32>
    %76 = math.tanh %75 : vector<2x32xf32>
    %c12_49 = arith.constant 12 : index
    %c0_50 = arith.constant 0 : index
    %77 = vector.load %arg9[%c12_49, %c0_50] : memref<16x32xf32, #tpu.memory_space<vmem>>, vector<2x32xf32>
    tpu.vector_store %arg9[%c12_49, %c0_50], %76 {strides = array<i32>} : memref<16x32xf32, #tpu.memory_space<vmem>>, vector<2x32xf32>,
    %c14 = arith.constant 14 : index
    %c0_51 = arith.constant 0 : index
    %78 = vector.load %arg0[%c14, %c0_51] : memref<16x32xf32, #tpu.memory_space<vmem>>, vector<2x32xf32>
    %cst_52 = arith.constant dense<0.000000e+00> : vector<2x32xf32>
    %79 = tpu.matmul %71, %0, %cst_52 {dimension_numbers = #tpu.dot_dimension_numbers<[1], [0], [0], [1], [0, 0, 1, 1], [], []>} : vector<2x32xf32>, vector<32x32xf32>, vector<2x32xf32> -> vector<2x32xf32>
    %80 = arith.addf %78, %79 : vector<2x32xf32>
    %81 = math.tanh %80 : vector<2x32xf32>
    %cst_53 = arith.constant dense<0.000000e+00> : vector<2x32xf32>
    %82 = tpu.matmul %81, %1, %cst_53 {dimension_numbers = #tpu.dot_dimension_numbers<[1], [0], [0], [1], [0, 0, 1, 1], [], []>} : vector<2x32xf32>, vector<32x32xf32>, vector<2x32xf32> -> vector<2x32xf32>
    %83 = arith.addf %82, %5 : vector<2x32xf32>
    %cst_54 = arith.constant dense<0.000000e+00> : vector<2x32xf32>
    %84 = tpu.matmul %76, %2, %cst_54 {dimension_numbers = #tpu.dot_dimension_numbers<[1], [0], [0], [1], [0, 0, 1, 1], [], []>} : vector<2x32xf32>, vector<32x32xf32>, vector<2x32xf32> -> vector<2x32xf32>
    %85 = arith.addf %83, %84 : vector<2x32xf32>
    %86 = math.tanh %85 : vector<2x32xf32>
    %c14_55 = arith.constant 14 : index
    %c0_56 = arith.constant 0 : index
    %87 = vector.load %arg9[%c14_55, %c0_56] : memref<16x32xf32, #tpu.memory_space<vmem>>, vector<2x32xf32>
    tpu.vector_store %arg9[%c14_55, %c0_56], %86 {strides = array<i32>} : memref<16x32xf32, #tpu.memory_space<vmem>>, vector<2x32xf32>,
    %c0_57 = arith.constant 0 : index
    %c0_58 = arith.constant 0 : index
    %c0_59 = arith.constant 0 : index
    %88 = vector.load %arg8[%c0_57, %c0_58, %c0_59] : memref<2x2x32xf32, #tpu.memory_space<vmem>>, vector<1x2x32xf32>
    %89 = vector.shape_cast %88 : vector<1x2x32xf32> to vector<2x32xf32>
    %90 = vector.shape_cast %81 : vector<2x32xf32> to vector<1x2x32xf32>
    tpu.vector_store %arg8[%c0_57, %c0_58, %c0_59], %90 {strides = array<i32>} : memref<2x2x32xf32, #tpu.memory_space<vmem>>, vector<1x2x32xf32>,
    %c1 = arith.constant 1 : index
    %c0_60 = arith.constant 0 : index
    %c0_61 = arith.constant 0 : index
    %91 = vector.load %arg8[%c1, %c0_60, %c0_61] : memref<2x2x32xf32, #tpu.memory_space<vmem>>, vector<1x2x32xf32>
    %92 = vector.shape_cast %91 : vector<1x2x32xf32> to vector<2x32xf32>
    %93 = vector.shape_cast %86 : vector<2x32xf32> to vector<1x2x32xf32>
    tpu.vector_store %arg8[%c1, %c0_60, %c0_61], %93 {strides = array<i32>} : memref<2x2x32xf32, #tpu.memory_space<vmem>>, vector<1x2x32xf32>,
    %c0_62 = arith.constant 0 : index
    %c0_63 = arith.constant 0 : index
    %94 = vector.load %arg6[%c0_62, %c0_63] : memref<1x16xf32, #tpu.memory_space<vmem>>, vector<1x16xf32>
    %95 = vector.shape_cast %94 : vector<1x16xf32> to vector<1x16xf32>
    %96 = vector.broadcast %95 : vector<1x16xf32> to vector<16x16xf32>
    %c0_64 = arith.constant 0 : index
    %c0_65 = arith.constant 0 : index
    %97 = vector.load %arg9[%c0_64, %c0_65] : memref<16x32xf32, #tpu.memory_space<vmem>>, vector<16x32xf32>
    %c0_66 = arith.constant 0 : index
    %c0_67 = arith.constant 0 : index
    %98 = vector.load %arg5[%c0_66, %c0_67] : memref<32x16xf32, #tpu.memory_space<vmem>>, vector<32x16xf32>
    %cst_68 = arith.constant dense<0.000000e+00> : vector<16x16xf32>
    %99 = tpu.matmul %97, %98, %cst_68 {dimension_numbers = #tpu.dot_dimension_numbers<[1], [0], [0], [1], [0, 0, 1, 1], [], []>} : vector<16x32xf32>, vector<32x16xf32>, vector<16x16xf32> -> vector<16x16xf32>
    %100 = arith.addf %99, %96 : vector<16x16xf32>
    %c0_69 = arith.constant 0 : index
    %c0_70 = arith.constant 0 : index
    %101 = vector.load %arg7[%c0_69, %c0_70] : memref<16x16xf32, #tpu.memory_space<vmem>>, vector<16x16xf32>
    tpu.vector_store %arg7[%c0_69, %c0_70], %100 {strides = array<i32>} : memref<16x16xf32, #tpu.memory_space<vmem>>, vector<16x16xf32>,
    return
  }
}

</mosaic_0001>

<bundles_post_ra>
// kernel: fakespeare_forward.1
= control target key start
LH: loop header
LB: loop body
LE: loop exit
PB: predicated region body
PF: predicated region fallthrough
CT: control target
= control target key end

     0   :  { %v2611_v3 = vmov 0.0|0.0   ;;  %vm2612_vm0 = vmmov 0   ;;  %v2613_v6 = vmov 0.0   ;;  %s2960_s0 = inlined_call_operand.vmem [shape: f32[16,32], index: 0, kind: input, shape index: {}]   ;;  %s2961_s1 = inlined_call_operand.vmem [shape: f32[32,32], index: 1, kind: input, shape index: {}]   ;;  %s2962_s2 = inlined_call_operand.vmem [shape: f32[32,32], index: 2, kind: input, shape index: {}]   ;;  %s2963_s3 = inlined_call_operand.vmem [shape: f32[32,32], index: 3, kind: input, shape index: {}]   ;;  %s2964_s4 = inlined_call_operand.vmem [shape: f32[1,32], index: 4, kind: input, shape index: {}]   ;;  %s2965_s5 = inlined_call_operand.vmem [shape: f32[32,16], index: 5, kind: input, shape index: {}]   ;;  %s2966_s6 = inlined_call_operand.vmem [shape: f32[1,16], index: 6, kind: input, shape index: {}]   ;;  %s2967_s7 = inlined_call_operand.vmem [shape: f32[16,16], index: 7, kind: output, shape index: {0}]   ;;  %s2968_s8 = inlined_call_operand.hbm [shape: f32[2,2,32], index: 8, kind: output, shape index: {1}]  }
   0x1   :  { %v29_v0 = vld [vmem:[%s2961_s1] sm:$0xff]  ;;  %v30_v1 = vld [vmem:[%s2961_s1 + $0x8] sm:$0xff]  ;;  %v31_v2 = vld [vmem:[%s2961_s1 + $0x10] sm:$0xff]  ;;  %2373 = vmatprep.subr.bf16.mxu0 %v2611_v3  ;;  %2106 = vmatprep.mubr.msk.f32.mxu0 %vm2612_vm0, %v2613_v6 }
   0x2   :  { %v2672_v4 = vpack.c.bf16 %v30_v1, %v29_v0  ;;  %v32_v5 = vld [vmem:[%s2961_s1 + $0x18] sm:$0xff] }
   0x3   :  { %14 = vsyncpa [#allocation4], 0  ;;  %2379 = vmatprep.subr.bf16.mxu1 %v2611_v3  ;;  %2117 = vmatprep.mubr.msk.f32.mxu1 %vm2612_vm0, %v2613_v6  ;;  %v2683_v7 = vpack.c.bf16 %v32_v5, %v31_v2  ;;  %v33_v8 = vld [vmem:[%s2962_s2] sm:$0xff]  ;;  %v34_v9 = vld [vmem:[%s2962_s2 + $0x8] sm:$0xff]  ;;  %vm49_vm1 = vcmask 261120   ;;  %vm270_vm2 = vcmask 254976  }
   0x4   :  { %2375 = vmatpush3.bf16.msra.mxu0 %v2672_v4  ;;  %v35_v10 = vld [vmem:[%s2962_s2 + $0x10] sm:$0xff]  ;;  %v2704_v11 = vpack.c.bf16 %v34_v9, %v33_v8  ;;  %v36_v12 = vld [vmem:[%s2962_s2 + $0x18] sm:$0xff]  ;;  %v48_v14 = vld [vmem:[%s2960_s0] sm:$0x3]  ;;  %s2614_s26 = smov [#allocation3]  }
   0x5   :  { %2376 = vmatprep.subr.bf16.mxu0 %v2611_v3  ;;  %v2710_v13 = vpack.c.bf16 %v36_v12, %v35_v10  ;;  %v37_v18 = vld [vmem:[%s2963_s3] sm:$0xff]  ;;  %v38_v19 = vld [vmem:[%s2963_s3 + $0x8] sm:$0xff]  ;;  %v39_v21 = vld [vmem:[%s2963_s3 + $0x10] sm:$0xff]  ;;  %s1933_s27 = sshll.u32 %s2614_s26, 4  ;;  %s1934_s27 = int_to_ptr.vmem [resolvable:$true] %s1933_s27 }
   0x6   :  { %2381 = vmatpush3.bf16.msra.mxu1 %v2704_v11  ;;  %v2724_v20 = vpack.c.bf16 %v38_v19, %v37_v18  ;;  %v40_v22 = vld [vmem:[%s2963_s3 + $0x18] sm:$0xff]  ;;  %v272_v25 = vld [vmem:[%s2960_s0 + $0x2] sm:$0x3]  ;;  %v2761_v29 = vld [vmem:[%s2964_s4] ss:$0 sm:$0xff]  ;;  %p2592_p1 = scmp.lt.s32.totalorder %s1934_s27, %s1934_s27 }
   0x7   :  { %2382 = vmatprep.subr.bf16.mxu1 %v2611_v3  ;;  %v2735_v24 = vpack.c.bf16 %v40_v22, %v39_v21  ;;  %v494_v35 = vld [vmem:[%s2960_s0 + $0x4] sm:$0x3]  ;;  %v716_v44 = vld [vmem:[%s2960_s0 + $0x6] sm:$0x3]  ;;  %v938_v53 = vld [vmem:[%s2960_s0 + $0x8] sm:$0x3] }
   0x8   :  { %2378 = vmatpush3.bf16.msra.mxu0 %v2683_v7  ;;  %v1160_v62 = vld [vmem:[%s2960_s0 + $0xa] sm:$0x3]  ;;  %v1382_v12 = vld [vmem:[%s2960_s0 + $0xc] sm:$0x3] }
   0x9   :  { %2391 = vmatprep.subr.bf16.mxu0 %v2611_v3 }
   0xa   :  { %2384 = vmatpush3.bf16.msra.mxu1 %v2710_v13 }
   0xb   :  { %2107 = vmatmul.mubr.f32.vlgmr.msra.gmra.mrb[0].mxu0 %v2613_v6  ;;  %2385 = vmatprep.subr.bf16.mxu1 %v2611_v3 }
   0xc   :  { %2393 = vmatpush3.bf16.msra.mxu0 %v2672_v4  ;;  %2139 = vmatprep.mubr.msk.f32.mxu0 %vm2612_vm0, %v2613_v6 }
   0xd   :  { %2394 = vmatprep.subr.bf16.mxu0 %v2611_v3 }
  0x10   :  { %2396 = vmatpush3.bf16.msra.mxu0 %v2683_v7 }
  0x11   :  { %2397 = vmatprep.subr.bf16.mxu0 %v2611_v3 }
  0xde   :  { %v119_v15 = vpop.f32.mrb[0].mxu0 }
  0xdf   :  { %v123_v16 = vadd.f32 %v119_v15, %v48_v14  ;;  %v2108_v17 = vpop.f32.mrb[1].mxu0 }
  0xe1   :  { %2555 = vtanh.f32 %v123_v16 }
  0xeb   :  { %v2556_v23 = vpop.eup %2555 }
  0xec   :  { %2118 = vmatmul.mubr.msk.f32.vlgmr.msra.gmra.mrb[0].mxu1 %vm49_vm1, %v2556_v23  ;;  %2140 = vmatmul.mubr.msk.f32.vlgmr.msra.gmra.mrb[2].mxu0 %vm49_vm1, %v2556_v23 }
  0xed   :  { %2387 = vmatpush3.bf16.msra.mxu1 %v2724_v20  ;;  %2128 = vmatprep.mubr.msk.f32.mxu1 %vm2612_vm0, %v2613_v6 }
  0xee   :  { %2388 = vmatprep.subr.bf16.mxu1 %v2611_v3  ;;  %2399 = vmatpush3.bf16.msra.mxu0 %v2704_v11 }
  0xef   :  { %2400 = vmatprep.subr.bf16.mxu0 %v2611_v3  ;;  %2150 = vmatprep.mubr.msk.f32.mxu0 %vm2612_vm0, %v2613_v6 }
  0xf1   :  { %2390 = vmatpush3.bf16.msra.mxu1 %v2735_v24 }
  0xf2   :  { %2409 = vmatprep.subr.bf16.mxu1 %v2611_v3  ;;  %2402 = vmatpush3.bf16.msra.mxu0 %v2710_v13 }
  0xf3   :  { %2403 = vmatprep.subr.bf16.mxu0 %v2611_v3 }
  0xf4   :  { %2129 = vmatmul.mubr.f32.vlgmr.msra.gmra.mrb[0].mxu1 %v2613_v6 }
  0xf5   :  { %2411 = vmatpush3.bf16.msra.mxu1 %v2672_v4  ;;  %2172 = vmatprep.mubr.msk.f32.mxu1 %vm2612_vm0, %v2613_v6 }
  0xf6   :  { %2412 = vmatprep.subr.bf16.mxu1 %v2611_v3 }
  0xf9   :  { %2414 = vmatpush3.bf16.msra.mxu1 %v2683_v7 }
  0xfa   :  { %2415 = vmatprep.subr.bf16.mxu1 %v2611_v3 }
 0x1bf   :  { %v339_v26 = vpop.f32.mrb[2].mxu0 }
 0x1c0   :  { %v343_v27 = vadd.f32 %v339_v26, %v272_v25  ;;  %v2141_v28 = vpop.f32.mrb[3].mxu0 }
 0x1c2   :  { %2557 = vtanh.f32 %v343_v27 }
 0x1c7   :  { %v264_v30 = vpop.f32.mrb[0].mxu1 }
 0x1c8   :  { %v2525_v31 = vadd.f32 %v2761_v29, %v264_v30  ;;  %v2130_v32 = vpop.f32.mrb[1].mxu1 }
 0x1ca   :  { %2559 = vtanh.f32 %v2525_v31  ;;  %v1838_v31 = vld [vmem:[%s2965_s5] sm:$0xff] }
 0x1cc   :  { %v2558_v33 = vpop.eup %2557 }
 0x1cd   :  { %2151 = vmatmul.mubr.msk.f32.vlgmr.msra.gmra.mrb[4].mxu0 %vm49_vm1, %v2558_v33  ;;  %2173 = vmatmul.mubr.msk.f32.vlgmr.msra.gmra.mrb[2].mxu1 %vm49_vm1, %v2558_v33 }
 0x1ce   :  { %2405 = vmatpush3.bf16.msra.mxu0 %v2724_v20  ;;  %2161 = vmatprep.mubr.msk.f32.mxu0 %vm2612_vm0, %v2613_v6 }
 0x1cf   :  { %2406 = vmatprep.subr.bf16.mxu0 %v2611_v3  ;;  %2417 = vmatpush3.bf16.msra.mxu1 %v2704_v11 }
 0x1d0   :  { %2418 = vmatprep.subr.bf16.mxu1 %v2611_v3  ;;  %2183 = vmatprep.mubr.msk.f32.mxu1 %vm2612_vm0, %v2613_v6 }
 0x1d2   :  { %2408 = vmatpush3.bf16.msra.mxu0 %v2735_v24 }
 0x1d3   :  { %2427 = vmatprep.subr.bf16.mxu0 %v2611_v3  ;;  %2420 = vmatpush3.bf16.msra.mxu1 %v2710_v13 }
 0x1d4   :  { %v2560_v34 = vpop.eup %2559  ;;  %2421 = vmatprep.subr.bf16.mxu1 %v2611_v3 }
 0x1d5   :  { %271 = vst.msk [vmem:[#allocation2] sm:$0x3] %vm270_vm2, %v2560_v34  ;;  %2162 = vmatmul.mubr.msk.f32.vlgmr.msra.gmra.mrb[4].mxu0 %vm49_vm1, %v2560_v34 }
 0x1d6   :  { %2429 = vmatpush3.bf16.msra.mxu0 %v2672_v4  ;;  %2205 = vmatprep.mubr.msk.f32.mxu0 %vm2612_vm0, %v2613_v6 }
 0x1d7   :  { %2430 = vmatprep.subr.bf16.mxu0 %v2611_v3 }
 0x1da   :  { %2432 = vmatpush3.bf16.msra.mxu0 %v2683_v7 }
 0x1db   :  { %2433 = vmatprep.subr.bf16.mxu0 %v2611_v3 }
 0x2a0   :  { %v561_v36 = vpop.f32.mrb[2].mxu1 }
 0x2a1   :  { %v565_v37 = vadd.f32 %v561_v36, %v494_v35  ;;  %v2174_v38 = vpop.f32.mrb[3].mxu1 }
 0x2a3   :  { %2561 = vtanh.f32 %v565_v37 }
 0x2a8   :  { %v487_v39 = vpop.f32.mrb[4].mxu0 }
 0x2a9   :  { %v2526_v40 = vadd.f32 %v2761_v29, %v487_v39  ;;  %v2163_v41 = vpop.f32.mrb[5].mxu0 }
 0x2ab   :  { %2563 = vtanh.f32 %v2526_v40 }
 0x2ad   :  { %v2562_v42 = vpop.eup %2561 }
 0x2ae   :  { %2184 = vmatmul.mubr.msk.f32.vlgmr.msra.gmra.mrb[4].mxu1 %vm49_vm1, %v2562_v42  ;;  %2206 = vmatmul.mubr.msk.f32.vlgmr.msra.gmra.mrb[6].mxu0 %vm49_vm1, %v2562_v42 }
 0x2af   :  { %2423 = vmatpush3.bf16.msra.mxu1 %v2724_v20  ;;  %2194 = vmatprep.mubr.msk.f32.mxu1 %vm2612_vm0, %v2613_v6 }
 0x2b0   :  { %2424 = vmatprep.subr.bf16.mxu1 %v2611_v3  ;;  %2435 = vmatpush3.bf16.msra.mxu0 %v2704_v11 }
 0x2b1   :  { %2436 = vmatprep.subr.bf16.mxu0 %v2611_v3  ;;  %2216 = vmatprep.mubr.msk.f32.mxu0 %vm2612_vm0, %v2613_v6 }
 0x2b3   :  { %2426 = vmatpush3.bf16.msra.mxu1 %v2735_v24 }
 0x2b4   :  { %2445 = vmatprep.subr.bf16.mxu1 %v2611_v3  ;;  %2438 = vmatpush3.bf16.msra.mxu0 %v2710_v13 }
 0x2b5   :  { %v2564_v43 = vpop.eup %2563  ;;  %2439 = vmatprep.subr.bf16.mxu0 %v2611_v3 }
 0x2b6   :  { %493 = vst.msk [vmem:[#allocation2 + $0x2] sm:$0x3] %vm270_vm2, %v2564_v43  ;;  %2195 = vmatmul.mubr.msk.f32.vlgmr.msra.gmra.mrb[4].mxu1 %vm49_vm1, %v2564_v43 }
 0x2b7   :  { %2447 = vmatpush3.bf16.msra.mxu1 %v2672_v4  ;;  %2238 = vmatprep.mubr.msk.f32.mxu1 %vm2612_vm0, %v2613_v6 }
 0x2b8   :  { %2448 = vmatprep.subr.bf16.mxu1 %v2611_v3 }
 0x2bb   :  { %2450 = vmatpush3.bf16.msra.mxu1 %v2683_v7 }
 0x2bc   :  { %2451 = vmatprep.subr.bf16.mxu1 %v2611_v3 }
 0x381   :  { %v783_v45 = vpop.f32.mrb[6].mxu0 }
 0x382   :  { %v787_v46 = vadd.f32 %v783_v45, %v716_v44  ;;  %v2207_v47 = vpop.f32.mrb[7].mxu0 }
 0x384   :  { %2565 = vtanh.f32 %v787_v46 }
 0x389   :  { %v709_v48 = vpop.f32.mrb[4].mxu1 }
 0x38a   :  { %v2527_v49 = vadd.f32 %v2761_v29, %v709_v48  ;;  %v2196_v50 = vpop.f32.mrb[5].mxu1 }
 0x38c   :  { %2567 = vtanh.f32 %v2527_v49 }
 0x38e   :  { %v2566_v51 = vpop.eup %2565 }
 0x38f   :  { %2217 = vmatmul.mubr.msk.f32.vlgmr.msra.gmra.mrb[8].mxu0 %vm49_vm1, %v2566_v51  ;;  %2239 = vmatmul.mubr.msk.f32.vlgmr.msra.gmra.mrb[6].mxu1 %vm49_vm1, %v2566_v51 }
 0x390   :  { %2441 = vmatpush3.bf16.msra.mxu0 %v2724_v20  ;;  %2227 = vmatprep.mubr.msk.f32.mxu0 %vm2612_vm0, %v2613_v6 }
 0x391   :  { %2442 = vmatprep.subr.bf16.mxu0 %v2611_v3  ;;  %2453 = vmatpush3.bf16.msra.mxu1 %v2704_v11 }
 0x392   :  { %2454 = vmatprep.subr.bf16.mxu1 %v2611_v3  ;;  %2249 = vmatprep.mubr.msk.f32.mxu1 %vm2612_vm0, %v2613_v6 }
 0x394   :  { %2444 = vmatpush3.bf16.msra.mxu0 %v2735_v24 }
 0x395   :  { %2463 = vmatprep.subr.bf16.mxu0 %v2611_v3  ;;  %2456 = vmatpush3.bf16.msra.mxu1 %v2710_v13 }
 0x396   :  { %v2568_v52 = vpop.eup %2567  ;;  %2457 = vmatprep.subr.bf16.mxu1 %v2611_v3 }
 0x397   :  { %715 = vst.msk [vmem:[#allocation2 + $0x4] sm:$0x3] %vm270_vm2, %v2568_v52  ;;  %2228 = vmatmul.mubr.msk.f32.vlgmr.msra.gmra.mrb[8].mxu0 %vm49_vm1, %v2568_v52 }
 0x398   :  { %2465 = vmatpush3.bf16.msra.mxu0 %v2672_v4  ;;  %2271 = vmatprep.mubr.msk.f32.mxu0 %vm2612_vm0, %v2613_v6 }
 0x399   :  { %2466 = vmatprep.subr.bf16.mxu0 %v2611_v3 }
 0x39c   :  { %2468 = vmatpush3.bf16.msra.mxu0 %v2683_v7 }
 0x39d   :  { %2469 = vmatprep.subr.bf16.mxu0 %v2611_v3 }
 0x462   :  { %v1005_v54 = vpop.f32.mrb[6].mxu1 }
 0x463   :  { %v1009_v55 = vadd.f32 %v1005_v54, %v938_v53  ;;  %v2240_v56 = vpop.f32.mrb[7].mxu1 }
 0x465   :  { %2569 = vtanh.f32 %v1009_v55 }
 0x46a   :  { %v931_v57 = vpop.f32.mrb[8].mxu0 }
 0x46b   :  { %v2528_v58 = vadd.f32 %v2761_v29, %v931_v57  ;;  %v2229_v59 = vpop.f32.mrb[9].mxu0 }
 0x46d   :  { %2571 = vtanh.f32 %v2528_v58 }
 0x46f   :  { %v2570_v60 = vpop.eup %2569 }
 0x470   :  { %2250 = vmatmul.mubr.msk.f32.vlgmr.msra.gmra.mrb[8].mxu1 %vm49_vm1, %v2570_v60  ;;  %2272 = vmatmul.mubr.msk.f32.vlgmr.msra.gmra.mrb[10].mxu0 %vm49_vm1, %v2570_v60 }
 0x471   :  { %2459 = vmatpush3.bf16.msra.mxu1 %v2724_v20  ;;  %2260 = vmatprep.mubr.msk.f32.mxu1 %vm2612_vm0, %v2613_v6 }
 0x472   :  { %2460 = vmatprep.subr.bf16.mxu1 %v2611_v3  ;;  %2471 = vmatpush3.bf16.msra.mxu0 %v2704_v11 }
 0x473   :  { %2472 = vmatprep.subr.bf16.mxu0 %v2611_v3  ;;  %2282 = vmatprep.mubr.msk.f32.mxu0 %vm2612_vm0, %v2613_v6 }
 0x475   :  { %2462 = vmatpush3.bf16.msra.mxu1 %v2735_v24 }
 0x476   :  { %2481 = vmatprep.subr.bf16.mxu1 %v2611_v3  ;;  %2474 = vmatpush3.bf16.msra.mxu0 %v2710_v13 }
 0x477   :  { %v2572_v61 = vpop.eup %2571  ;;  %2475 = vmatprep.subr.bf16.mxu0 %v2611_v3 }
 0x478   :  { %937 = vst.msk [vmem:[#allocation2 + $0x6] sm:$0x3] %vm270_vm2, %v2572_v61  ;;  %2261 = vmatmul.mubr.msk.f32.vlgmr.msra.gmra.mrb[8].mxu1 %vm49_vm1, %v2572_v61 }
 0x479   :  { %2483 = vmatpush3.bf16.msra.mxu1 %v2672_v4  ;;  %2304 = vmatprep.mubr.msk.f32.mxu1 %vm2612_vm0, %v2613_v6 }
 0x47a   :  { %2484 = vmatprep.subr.bf16.mxu1 %v2611_v3 }
 0x47d   :  { %2486 = vmatpush3.bf16.msra.mxu1 %v2683_v7 }
 0x47e   :  { %2487 = vmatprep.subr.bf16.mxu1 %v2611_v3 }
 0x47f   :  { %v1836_v21 = vld [vmem:[#allocation2] sm:$0xff] }
 0x543   :  { %v1227_v63 = vpop.f32.mrb[10].mxu0 }
 0x544   :  { %v1231_v0 = vadd.f32 %v1227_v63, %v1160_v62  ;;  %v2273_v1 = vpop.f32.mrb[11].mxu0 }
 0x546   :  { %2573 = vtanh.f32 %v1231_v0 }
 0x54b   :  { %v1153_v2 = vpop.f32.mrb[8].mxu1 }
 0x54c   :  { %v2529_v5 = vadd.f32 %v2761_v29, %v1153_v2  ;;  %v2262_v8 = vpop.f32.mrb[9].mxu1 }
 0x54e   :  { %2575 = vtanh.f32 %v2529_v5 }
 0x550   :  { %v2574_v9 = vpop.eup %2573 }
 0x551   :  { %2283 = vmatmul.mubr.msk.f32.vlgmr.msra.gmra.mrb[12].mxu0 %vm49_vm1, %v2574_v9  ;;  %2305 = vmatmul.mubr.msk.f32.vlgmr.msra.gmra.mrb[10].mxu1 %vm49_vm1, %v2574_v9 }
 0x552   :  { %2477 = vmatpush3.bf16.msra.mxu0 %v2724_v20  ;;  %2293 = vmatprep.mubr.msk.f32.mxu0 %vm2612_vm0, %v2613_v6 }
 0x553   :  { %2478 = vmatprep.subr.bf16.mxu0 %v2611_v3  ;;  %2489 = vmatpush3.bf16.msra.mxu1 %v2704_v11 }
 0x554   :  { %2490 = vmatprep.subr.bf16.mxu1 %v2611_v3  ;;  %2315 = vmatprep.mubr.msk.f32.mxu1 %vm2612_vm0, %v2613_v6 }
 0x556   :  { %2480 = vmatpush3.bf16.msra.mxu0 %v2735_v24 }
 0x557   :  { %2499 = vmatprep.subr.bf16.mxu0 %v2611_v3  ;;  %2492 = vmatpush3.bf16.msra.mxu1 %v2710_v13 }
 0x558   :  { %v2576_v10 = vpop.eup %2575  ;;  %2493 = vmatprep.subr.bf16.mxu1 %v2611_v3 }
 0x559   :  { %1159 = vst.msk [vmem:[#allocation2 + $0x8] sm:$0x3] %vm270_vm2, %v2576_v10  ;;  %2294 = vmatmul.mubr.msk.f32.vlgmr.msra.gmra.mrb[12].mxu0 %vm49_vm1, %v2576_v10 }
 0x55a   :  { %2501 = vmatpush3.bf16.msra.mxu0 %v2672_v4  ;;  %2337 = vmatprep.mubr.msk.f32.mxu0 %vm2612_vm0, %v2613_v6 }
 0x55b   :  { %2502 = vmatprep.subr.bf16.mxu0 %v2611_v3 }
 0x55e   :  { %2504 = vmatpush3.bf16.msra.mxu0 %v2683_v7 }
 0x55f   :  { %2505 = vmatprep.subr.bf16.mxu0 %v2611_v3 }
 0x624   :  { %v1449_v14 = vpop.f32.mrb[10].mxu1 }
 0x625   :  { %v1453_v15 = vadd.f32 %v1449_v14, %v1382_v12  ;;  %v2306_v16 = vpop.f32.mrb[11].mxu1 }
 0x627   :  { %2577 = vtanh.f32 %v1453_v15 }
 0x62c   :  { %v1375_v17 = vpop.f32.mrb[12].mxu0 }
 0x62d   :  { %v2530_v4 = vadd.f32 %v2761_v29, %v1375_v17  ;;  %v2295_v18 = vpop.f32.mrb[13].mxu0 }
 0x62f   :  { %2579 = vtanh.f32 %v2530_v4 }
 0x631   :  { %v2578_v19 = vpop.eup %2577 }
 0x632   :  { %2316 = vmatmul.mubr.msk.f32.vlgmr.msra.gmra.mrb[12].mxu1 %vm49_vm1, %v2578_v19  ;;  %2338 = vmatmul.mubr.msk.f32.vlgmr.msra.gmra.mrb[14].mxu0 %vm49_vm1, %v2578_v19 }
 0x633   :  { %2495 = vmatpush3.bf16.msra.mxu1 %v2724_v20  ;;  %2326 = vmatprep.mubr.msk.f32.mxu1 %vm2612_vm0, %v2613_v6 }
 0x634   :  { %2496 = vmatprep.subr.bf16.mxu1 %v2611_v3  ;;  %2507 = vmatpush3.bf16.msra.mxu0 %v2704_v11  ;;  %v1604_v11 = vld [vmem:[%s2960_s0 + $0xe] sm:$0x3] }
 0x635   :  { %2508 = vmatprep.subr.bf16.mxu0 %v2611_v3  ;;  %2348 = vmatprep.mubr.msk.f32.mxu0 %vm2612_vm0, %v2613_v6 }
 0x637   :  { %2498 = vmatpush3.bf16.msra.mxu1 %v2735_v24 }
 0x638   :  { %2510 = vmatpush3.bf16.msra.mxu0 %v2710_v13 }
 0x639   :  { %v2580_v7 = vpop.eup %2579  ;;  %2511 = vmatprep.subr.bf16.mxu0 %v2611_v3 }
 0x63a   :  { %1381 = vst.msk [vmem:[#allocation2 + $0xa] sm:$0x3] %vm270_vm2, %v2580_v7  ;;  %2327 = vmatmul.mubr.msk.f32.vlgmr.msra.gmra.mrb[12].mxu1 %vm49_vm1, %v2580_v7 }
 0x63b   :  { %2370 = vmatprep.mubr.msk.f32.mxu1 %vm49_vm1, %v1836_v21 }
 0x705   :  { %v1671_v22 = vpop.f32.mrb[14].mxu0 }
 0x706   :  { %v1675_v23 = vadd.f32 %v1671_v22, %v1604_v11  ;;  %v2339_v25 = vpop.f32.mrb[15].mxu0 }
 0x708   :  { %2581 = vtanh.f32 %v1675_v23 }
 0x70d   :  { %v1597_v26 = vpop.f32.mrb[12].mxu1 }
 0x70e   :  { %v2531_v13 = vadd.f32 %v2761_v29, %v1597_v26  ;;  %v2328_v27 = vpop.f32.mrb[13].mxu1 }
 0x710   :  { %2583 = vtanh.f32 %v2531_v13 }
 0x712   :  { %v2582_v28 = vpop.eup %2581 }
 0x713   :  { %1826 = vst.msk [vmem:[#allocation3] sm:$0x3] %vm270_vm2, %v2582_v28  ;;  %2349 = vmatmul.mubr.msk.f32.vlgmr.msra.gmra.mrb[16].mxu0 %vm49_vm1, %v2582_v28 }
 0x714   :  { %2513 = vmatpush3.bf16.msra.mxu0 %v2724_v20  ;;  %2359 = vmatprep.mubr.msk.f32.mxu0 %vm2612_vm0, %v2613_v6  ;;  %v1839_v20 = vld [vmem:[%s2965_s5 + $0x8] sm:$0xff]  ;;  %v1841_v6 = vld [vmem:[%s2965_s5 + $0x18] sm:$0xff] }
 0x715   :  { %2514 = vmatprep.subr.bf16.mxu0 %v2611_v3  ;;  %v2517_v32 = vpack.c.bf16 %v1839_v20, %v1838_v31  ;;  %v1840_v3 = vld [vmem:[%s2965_s5 + $0x10] sm:$0xff]  ;;  %s2587_s5 = scalar_lea.vmem %s1934_s27, 64 }
 0x716   :  { %p2588_p0 = scmp.ne.s32.totalorder %s1934_s27, %s2587_s5  ;;  %p2593_p2 = scmp.lt.s32.totalorder %s2587_s5, %s2587_s5 }
 0x717   :  { %2518 = vmatprep.subr.bf16.mxu1 %v2517_v32 }
 0x718   :  { %2516 = vmatpush3.bf16.msra.mxu0 %v2735_v24  ;;  %2520 = vmatpush3.bf16.msra.mxu1 %v2517_v32  ;;  %v2521_v24 = vpack.c.bf16 %v1841_v6, %v1840_v3  ;;  %p2594_p3 = por %p2593_p2, %p2592_p1 }
 0x71a   :  { %v2584_v30 = vpop.eup %2583  ;;  %2522 = vmatprep.subr.bf16.mxu1 %v2521_v24  ;;  %p2595_p4 = pnand %p2594_p3, %p2588_p0 }
 0x71b   :  { %1603 = vst.msk [vmem:[#allocation2 + $0xc] sm:$0x3] %vm270_vm2, %v2584_v30  ;;  %2360 = vmatmul.mubr.msk.f32.vlgmr.msra.gmra.mrb[16].mxu0 %vm49_vm1, %v2584_v30 }
 0x71c   :  { %2524 = vmatpush3.bf16.msra.mxu1 %v2521_v24 }
 0x7ee   :  { %v1819_v33 = vpop.f32.mrb[16].mxu0 }
 0x7ef   :  { %v2532_v34 = vadd.f32 %v2761_v29, %v1819_v33  ;;  %v2361_v35 = vpop.f32.mrb[17].mxu0 }
 0x7f1   :  { %2585 = vtanh.f32 %v2532_v34 }
 0x7fb   :  { %v2586_v36 = vpop.eup %2585 }
 0x7fc   :  { %1825 = vst.msk [vmem:[#allocation2 + $0xe] sm:$0x3] %vm270_vm2, %v2586_v36  ;;  %1828 = vst.msk [vmem:[#allocation3 + $0x2] sm:$0x3] %vm270_vm2, %v2586_v36 }
 0x803   :  { %v1837_v37 = vld [vmem:[#allocation2 + $0x8] sm:$0xff] }
 0x804   :  { %2371 = vmatmul.mubr.msk.f32.vlgmr.msra.gmra.mrb[14].mxu1 %vm49_vm1, %v1837_v37 }
 0x805   :  { %2598 = shalt.err (!%p2595_p4)
}
 0x806   :  { %s2599_s29 = scalar_lea.hbm %s2968_s8, 64 }
 0x807   :  { %p2600_p5 = scmp.ne.s32.totalorder %s2968_s8, %s2599_s29  ;;  %p2603_p6 = scmp.lt.u32.totalorder %s2599_s29, %s2968_s8 }
 0x809   :  { %p2605_p7 = pnand %p2603_p6, %p2600_p5 }
 0x80b   :  { %2608 = shalt.err (!%p2605_p7)
}
 0x80c   :  { %s2615_s11 = smov 32   ;;  %s2616_s12 = smov 2   ;;  %v1969_v29 = vld [vmem:[%s2966_s6] ss:$0 sm:$0xff]  ;;  %vm1923_vm3 = vcmask 130048  }
 0x80d   :  { %1939 = dma.vmem_to_hbm [thread:$0]  %s1934_s27, 64, %s2968_s8, [#allocation4], %s2615_s11, %s2615_s11, %s2616_s12  }
 0x8d7   :  { %v2372_v38 = vpop.f32.mrb[14].mxu1 }
 0x8d8   :  { %v1920_v39 = vadd.f32 %v2372_v38, %v1969_v29  ;;  %v1914_v40 = vpop.f32.mrb[15].mxu1 }
 0x8d9   :  { %v1915_v41 = vadd.f32 %v1969_v29, %v1914_v40 }
 0x8da   :  { %1925 = vst.msk [vmem:[%s2967_s7 + $0x8] sm:$0xff] %vm1923_vm3, %v1920_v39 }
 0x8db   :  { %1924 = vst.msk [vmem:[%s2967_s7] sm:$0xff] %vm1923_vm3, %v1915_v41 }
 0x8dc   :  { %2609 = dma.done.wait [#allocation4], 64  }
 0x8dd   :  { %2610 = vsyncadd [#allocation4], 4294967232 }
 0x8de   :  { %1945 = vsyncpa [#allocation4], 1 }

</bundles_post_ra>
